<compile_context>
chip_gen: v6e
topology: v6e:2x2x1
jax: 0.10.0
libtpu: 0.0.40
codegen_flags: <defaults>
</compile_context>

<pallas_src>
import functools

import jax
import jax.numpy as jnp
from jax.experimental import pallas as pl
from jax.experimental.pallas import tpu as pltpu

EPS = 1e-5


def _round_up(x, m):
    return (x + m - 1) // m * m


def _sublane_granule(dtype):
    # f32 -> 8 rows per sublane tile, bf16 -> 16, int8/fp8 -> 32.
    return max(8, 32 // jnp.dtype(dtype).itemsize)


@functools.lru_cache(maxsize=None)
def _vmem_params():
    """(per-block footprint budget, scoped vmem limit) in bytes, per TPU gen."""
    try:
        kind = jax.devices()[0].device_kind.lower()
    except Exception:  # pragma: no cover - defensive
        kind = ""
    if "v7" in kind:
        # v7x: 64 MiB physical VMEM per TensorCore -> leave headroom.
        return 28 * 1024 * 1024, 48 * 1024 * 1024
    # v4 / v5e / v6e: 128 MiB physical VMEM.
    return 48 * 1024 * 1024, 96 * 1024 * 1024


def _vmem_limit():
    return _vmem_params()[1]


def _elems_budget(itemsize):
    """Max elements per block so double-buffered I/O + f32 temps fit the budget."""
    footprint, _ = _vmem_params()
    per_elem = 4 * itemsize + 12  # 2x in (dbuf) + 2x out (dbuf) + ~3 f32 temps
    return max(8 * 128, footprint // per_elem)


# ---------------------------------------------------------------------------
# BatchNorm1d (training-mode batch statistics), per-channel over the batch axis
# ---------------------------------------------------------------------------
def _batchnorm_kernel(x_ref, w_ref, b_ref, o_ref, *, inv_n):
    """Single-pass kernel: full batch resident, block (N, TC)."""
    x = x_ref[...].astype(jnp.float32)                      # (N, TC)
    mean = jnp.sum(x, axis=0, keepdims=True) * inv_n        # (1, TC)
    meansq = jnp.sum(x * x, axis=0, keepdims=True) * inv_n
    var = jnp.maximum(meansq - mean * mean, 0.0)            # biased variance
    scale = w_ref[...] * jax.lax.rsqrt(var + EPS)           # (1, TC)
    shift = b_ref[...] - mean * scale
    o_ref[...] = (x * scale + shift).astype(o_ref.dtype)    # fused mul + add


def _bn_stats_kernel(x_ref, w_ref, b_ref, scale_ref, shift_ref,
                     sum_ref, sq_ref, *, inv_n, tn, n_total, mask_rows):
    """Two-pass path, pass 1: accumulate per-channel sum / sum-of-squares."""
    i = pl.program_id(1)  # batch-tile (reduction) axis, iterated last

    @pl.when(i == 0)
    def _():
        sum_ref[...] = jnp.zeros_like(sum_ref)
        sq_ref[...] = jnp.zeros_like(sq_ref)

    x = x_ref[...].astype(jnp.float32)                      # (TN, TC)
    if mask_rows:
        row = jax.lax.broadcasted_iota(jnp.int32, x.shape, 0)
        x = jnp.where(row < (n_total - i * tn), x, 0.0)     # drop ragged rows
    sum_ref[...] += jnp.sum(x, axis=0, keepdims=True)
    sq_ref[...] += jnp.sum(x * x, axis=0, keepdims=True)

    @pl.when(i == pl.num_programs(1) - 1)
    def _():
        mean = sum_ref[...] * inv_n
        var = jnp.maximum(sq_ref[...] * inv_n - mean * mean, 0.0)
        scale = w_ref[...] * jax.lax.rsqrt(var + EPS)
        scale_ref[...] = scale
        shift_ref[...] = b_ref[...] - mean * scale


def _affine_kernel(x_ref, scale_ref, shift_ref, o_ref):
    """Two-pass path, pass 2: y = x * scale + shift (elementwise)."""
    x = x_ref[...].astype(jnp.float32)
    o_ref[...] = (x * scale_ref[...] + shift_ref[...]).astype(o_ref.dtype)


def _batch_norm_single_pass(x, w2, b2, budget):
    n, c = x.shape
    if c <= 128:
        tc = c  # last block dim == full array dim (allowed for any c)
    else:
        g = pl.cdiv(c, 128)
        budget_groups = max(1, (budget // n) // 128)
        target_steps = min(4, g)  # aim for >=2-4 grid steps (megacore/pipeline)
        tc = 128 * min(budget_groups, max(1, g // target_steps))
    grid = (pl.cdiv(c, tc),)

    kernel = functools.partial(_batchnorm_kernel, inv_n=1.0 / n)
    return pl.pallas_call(
        kernel,
        out_shape=jax.ShapeDtypeStruct((n, c), x.dtype),
        grid_spec=pltpu.PrefetchScalarGridSpec(
            num_scalar_prefetch=0,
            grid=grid,
            in_specs=[
                pl.BlockSpec((n, tc), lambda j: (0, j)),
                pl.BlockSpec((1, tc), lambda j: (0, j)),
                pl.BlockSpec((1, tc), lambda j: (0, j)),
            ],
            out_specs=pl.BlockSpec((n, tc), lambda j: (0, j)),
        ),
        compiler_params=pltpu.CompilerParams(
            dimension_semantics=("parallel",),
            vmem_limit_bytes=_vmem_limit(),
        ),
    )(x, w2, b2)


def _batch_norm_two_pass(x, w2, b2, budget):
    """Large-N path: tiled stats reduction + separate normalize sweep."""
    n, c = x.shape
    gran = _sublane_granule(x.dtype)

    if c <= 1024:
        tc = c                      # single channel tile (block dim == array dim)
    else:
        tc = 1024                   # lane-dense multiple of 128; ragged last tile
    tn = max(gran, (budget // tc) // gran * gran)
    if tn >= n:
        tn = n
    n_tiles = pl.cdiv(n, tn)
    c_tiles = pl.cdiv(c, tc)
    mask_rows = (n % tn) != 0

    stats_kernel = functools.partial(
        _bn_stats_kernel, inv_n=1.0 / n, tn=tn, n_total=n, mask_rows=mask_rows)
    scale, shift = pl.pallas_call(
        stats_kernel,
        out_shape=(jax.ShapeDtypeStruct((1, c), jnp.float32),
                   jax.ShapeDtypeStruct((1, c), jnp.float32)),
        grid_spec=pltpu.PrefetchScalarGridSpec(
            num_scalar_prefetch=0,
            grid=(c_tiles, n_tiles),       # reduction (batch) axis last
            in_specs=[
                pl.BlockSpec((tn, tc), lambda j, i: (i, j)),
                pl.BlockSpec((1, tc), lambda j, i: (0, j)),
                pl.BlockSpec((1, tc), lambda j, i: (0, j)),
            ],
            out_specs=(
                pl.BlockSpec((1, tc), lambda j, i: (0, j)),
                pl.BlockSpec((1, tc), lambda j, i: (0, j)),
            ),
            scratch_shapes=[pltpu.VMEM((1, tc), jnp.float32),
                            pltpu.VMEM((1, tc), jnp.float32)],
        ),
        compiler_params=pltpu.CompilerParams(
            dimension_semantics=("parallel", "arbitrary"),
            vmem_limit_bytes=_vmem_limit(),
        ),
    )(x, w2, b2)

    return pl.pallas_call(
        _affine_kernel,
        out_shape=jax.ShapeDtypeStruct((n, c), x.dtype),
        grid_spec=pltpu.PrefetchScalarGridSpec(
            num_scalar_prefetch=0,
            grid=(n_tiles, c_tiles),
            in_specs=[
                pl.BlockSpec((tn, tc), lambda i, j: (i, j)),
                pl.BlockSpec((1, tc), lambda i, j: (0, j)),
                pl.BlockSpec((1, tc), lambda i, j: (0, j)),
            ],
            out_specs=pl.BlockSpec((tn, tc), lambda i, j: (i, j)),
        ),
        compiler_params=pltpu.CompilerParams(
            dimension_semantics=("parallel", "parallel"),
            vmem_limit_bytes=_vmem_limit(),
        ),
    )(x, scale, shift)


def batch_norm_1d(x, weight, bias):
    """Training-mode BatchNorm1d forward. x: (N, C); weight/bias: (C,)."""
    n, c = x.shape
    budget = _elems_budget(jnp.dtype(x.dtype).itemsize)
    w2 = weight.reshape(1, c).astype(jnp.float32)
    b2 = bias.reshape(1, c).astype(jnp.float32)
    min_tc = c if c < 128 else 128
    if n * min_tc <= budget:
        return _batch_norm_single_pass(x, w2, b2, budget)
    # Batch too large to keep resident per channel tile -> exact two-pass path.
    return _batch_norm_two_pass(x, w2, b2, budget)


# ---------------------------------------------------------------------------
# LayerNorm over the last dim (per-row), matching torch.nn.LayerNorm(dim)
# ---------------------------------------------------------------------------
def _layernorm_kernel(x_ref, w_ref, b_ref, o_ref, *, inv_c):
    x = x_ref[...].astype(jnp.float32)                       # (TN, C)
    mean = jnp.sum(x, axis=-1, keepdims=True) * inv_c        # (TN, 1)
    meansq = jnp.sum(x * x, axis=-1, keepdims=True) * inv_c
    var = jnp.maximum(meansq - mean * mean, 0.0)             # biased variance
    inv = jax.lax.rsqrt(var + EPS)                           # EUP
    o_ref[...] = ((x - mean) * (inv * w_ref[...]) + b_ref[...]).astype(o_ref.dtype)


def layer_norm(x, weight, bias):
    """LayerNorm over the last axis. x: (..., C); weight/bias: (C,)."""
    orig_shape = x.shape
    c = orig_shape[-1]
    if x.ndim != 2:
        x = x.reshape(-1, c)
    n = x.shape[0]
    gran = _sublane_granule(x.dtype)
    budget = _elems_budget(jnp.dtype(x.dtype).itemsize)

    w2 = weight.reshape(1, c).astype(jnp.float32)
    b2 = bias.reshape(1, c).astype(jnp.float32)

    # Row tile: multiple of the sublane granule, inside the VMEM budget, aiming
    # for ~4 grid steps so megacore sharding / pipelining kick in.  Ragged last
    # row block is handled by Pallas (per-row stats, OOB writes dropped).
    # TODO(synk): for C so large that one granule of rows exceeds VMEM, a
    # two-pass per-row reduction over channel tiles would be needed.
    max_tn = max(gran, (budget // c) // gran * gran)
    tn = min(max_tn, _round_up(pl.cdiv(n, 4), gran))
    if tn >= n:
        tn = n
    grid = (pl.cdiv(n, tn),)

    kernel = functools.partial(_layernorm_kernel, inv_c=1.0 / c)
    out = pl.pallas_call(
        kernel,
        out_shape=jax.ShapeDtypeStruct((n, c), x.dtype),
        grid_spec=pltpu.PrefetchScalarGridSpec(
            num_scalar_prefetch=0,
            grid=grid,
            in_specs=[
                pl.BlockSpec((tn, c), lambda i: (i, 0)),
                pl.BlockSpec((1, c), lambda i: (0, 0)),
                pl.BlockSpec((1, c), lambda i: (0, 0)),
            ],
            out_specs=pl.BlockSpec((tn, c), lambda i: (i, 0)),
        ),
        compiler_params=pltpu.CompilerParams(
            dimension_semantics=("parallel",),
            vmem_limit_bytes=_vmem_limit(),
        ),
    )(x, w2, b2)
    return out if len(orig_shape) == 2 else out.reshape(orig_shape)


# ---------------------------------------------------------------------------
# Module-equivalent wrapper
# ---------------------------------------------------------------------------
class Normalize:
    def __init__(self, dim=None, norm="batch"):
        if dim is None or norm == "none":
            self.norm_kind = "none"
        elif norm in ("batch", "layer"):
            self.norm_kind = norm
        else:
            self.norm_kind = "none"
        if self.norm_kind in ("batch", "layer"):
            # Deterministic PyTorch-default affine init: weight=1, bias=0.
            self.weight = jnp.ones((dim,), dtype=jnp.float32)
            self.bias = jnp.zeros((dim,), dtype=jnp.float32)
        # TODO(synk): training-mode BatchNorm1d also updates running_mean /
        # running_var buffers; the forward output does not depend on them, so
        # they are not produced here.

    def __call__(self, x):
        if self.norm_kind == "batch":
            # TODO(synk): only (N, C) inputs supported; BatchNorm1d's (N, C, L)
            # layout would need a channel-axis-1 variant.
            return batch_norm_1d(x, self.weight, self.bias)
        if self.norm_kind == "layer":
            return layer_norm(x, self.weight, self.bias)
        return x


if __name__ == "__main__":
    key = jax.random.PRNGKey(0)

    def bn_ref(x):
        mean = jnp.mean(x, axis=0, keepdims=True)
        var = jnp.mean((x - mean) ** 2, axis=0, keepdims=True)
        return (x - mean) / jnp.sqrt(var + EPS)

    def ln_ref(x):
        mean = jnp.mean(x, axis=-1, keepdims=True)
        var = jnp.mean((x - mean) ** 2, axis=-1, keepdims=True)
        return (x - mean) / jnp.sqrt(var + EPS)

    # Second case (20, 200) exercises ragged channel tiles, ragged row tiles,
    # and the batch-tile row masking in the two-pass reduction.
    for (N, C) in ((8, 32), (20, 200)):
        kx, key = jax.random.split(key)
        x = jax.random.normal(kx, (N, C), dtype=jnp.float32)

        # Default module behavior: BatchNorm1d(dim=C), training-mode batch stats.
        y_bn = jax.block_until_ready(Normalize(dim=C, norm="batch")(x))
        assert y_bn.shape == x.shape
        assert jnp.allclose(y_bn, bn_ref(x), atol=1e-4, rtol=1e-4), "batchnorm mismatch"

        # Force the large-N fallback (tiny artificial budget) and check it too.
        w1 = jnp.ones((1, C), jnp.float32)
        b1 = jnp.zeros((1, C), jnp.float32)
        y_tp = jax.block_until_ready(_batch_norm_two_pass(x, w1, b1, budget=1024))
        assert jnp.allclose(y_tp, bn_ref(x), atol=1e-4, rtol=1e-4), "2-pass batchnorm mismatch"

        # 'layer' path.
        y_ln = jax.block_until_ready(Normalize(dim=C, norm="layer")(x))
        assert y_ln.shape == x.shape
        assert jnp.allclose(y_ln, ln_ref(x), atol=1e-4, rtol=1e-4), "layernorm mismatch"

        # Identity ('none') path.
        assert jnp.array_equal(Normalize(dim=None, norm="none")(x), x)

    print("KERNEL_OK")
</pallas_src>

<mosaic_0001>
module attributes {stable_mosaic.version = 11 : i64} {
  func.func @_batchnorm_kernel(%arg0: i32, %arg1: memref<8x32xf32, #tpu.memory_space<vmem>>, %arg2: memref<1x32xf32, #tpu.memory_space<vmem>>, %arg3: memref<1x32xf32, #tpu.memory_space<vmem>>, %arg4: memref<8x32xf32, #tpu.memory_space<vmem>>) attributes {dimension_semantics = [#tpu.dimension_semantics<parallel>], iteration_bounds = array<i64: 1>, scalar_prefetch = 0 : i64, scratch_operands = 0 : i64, tpu.core_type = #tpu.core_type<tc>, window_params = [{transform_indices = @transform_0, window_bounds = array<i64: 8, 32>}, {transform_indices = @transform_1, window_bounds = array<i64: 1, 32>}, {transform_indices = @transform_2, window_bounds = array<i64: 1, 32>}, {transform_indices = @transform_3, window_bounds = array<i64: 8, 32>}]} {
    %c0 = arith.constant 0 : index
    %c0_0 = arith.constant 0 : index
    %0 = vector.load %arg1[%c0, %c0_0] : memref<8x32xf32, #tpu.memory_space<vmem>>, vector<8x32xf32>
    %cst = arith.constant dense<0.000000e+00> : vector<32xf32>
    %1 = vector.multi_reduction <add>, %0, %cst [0] : vector<8x32xf32> to vector<32xf32>
    %2 = vector.shape_cast %1 : vector<32xf32> to vector<1x32xf32>
    %cst_1 = arith.constant 1.250000e-01 : f32
    %3 = vector.broadcast %cst_1 : f32 to vector<1x32xf32>
    %4 = arith.mulf %2, %3 : vector<1x32xf32>
    %5 = arith.mulf %0, %0 : vector<8x32xf32>
    %cst_2 = arith.constant dense<0.000000e+00> : vector<32xf32>
    %6 = vector.multi_reduction <add>, %5, %cst_2 [0] : vector<8x32xf32> to vector<32xf32>
    %7 = vector.shape_cast %6 : vector<32xf32> to vector<1x32xf32>
    %cst_3 = arith.constant 1.250000e-01 : f32
    %8 = vector.broadcast %cst_3 : f32 to vector<1x32xf32>
    %9 = arith.mulf %7, %8 : vector<1x32xf32>
    %10 = arith.mulf %4, %4 : vector<1x32xf32>
    %11 = arith.subf %9, %10 : vector<1x32xf32>
    %cst_4 = arith.constant 0.000000e+00 : f32
    %12 = vector.broadcast %cst_4 : f32 to vector<1x32xf32>
    %13 = arith.maximumf %11, %12 : vector<1x32xf32>
    %c0_5 = arith.constant 0 : index
    %c0_6 = arith.constant 0 : index
    %14 = vector.load %arg2[%c0_5, %c0_6] : memref<1x32xf32, #tpu.memory_space<vmem>>, vector<1x32xf32>
    %cst_7 = arith.constant 9.99999974E-6 : f32
    %15 = vector.broadcast %cst_7 : f32 to vector<1x32xf32>
    %16 = arith.addf %13, %15 : vector<1x32xf32>
    %17 = math.rsqrt %16 : vector<1x32xf32>
    %18 = arith.mulf %14, %17 : vector<1x32xf32>
    %c0_8 = arith.constant 0 : index
    %c0_9 = arith.constant 0 : index
    %19 = vector.load %arg3[%c0_8, %c0_9] : memref<1x32xf32, #tpu.memory_space<vmem>>, vector<1x32xf32>
    %20 = arith.mulf %4, %18 : vector<1x32xf32>
    %21 = arith.subf %19, %20 : vector<1x32xf32>
    %22 = vector.broadcast %18 : vector<1x32xf32> to vector<8x32xf32>
    %23 = arith.mulf %0, %22 : vector<8x32xf32>
    %24 = vector.broadcast %21 : vector<1x32xf32> to vector<8x32xf32>
    %25 = arith.addf %23, %24 : vector<8x32xf32>
    %c0_10 = arith.constant 0 : index
    %c0_11 = arith.constant 0 : index
    %26 = vector.load %arg4[%c0_10, %c0_11] : memref<8x32xf32, #tpu.memory_space<vmem>>, vector<8x32xf32>
    tpu.vector_store %arg4[%c0_10, %c0_11], %25 {strides = array<i32>} : memref<8x32xf32, #tpu.memory_space<vmem>>, vector<8x32xf32>,
    return
  }
  func.func @transform_0(%arg0: i32) -> (i32, i32) {
    %c0_i32 = arith.constant 0 : i32
    %c0_i32_0 = arith.constant 0 : i32
    return %c0_i32, %arg0 : i32, i32
  }
  func.func @transform_1(%arg0: i32) -> (i32, i32) {
    %c0_i32 = arith.constant 0 : i32
    %c0_i32_0 = arith.constant 0 : i32
    return %c0_i32, %arg0 : i32, i32
  }
  func.func @transform_2(%arg0: i32) -> (i32, i32) {
    %c0_i32 = arith.constant 0 : i32
    %c0_i32_0 = arith.constant 0 : i32
    return %c0_i32, %arg0 : i32, i32
  }
  func.func @transform_3(%arg0: i32) -> (i32, i32) {
    %c0_i32 = arith.constant 0 : i32
    %c0_i32_0 = arith.constant 0 : i32
    return %c0_i32, %arg0 : i32, i32
  }
}

</mosaic_0001>

<bundles_post_ra>
// kernel: tpu_custom_call.1
= control target key start
LH: loop header
LB: loop body
LE: loop exit
PB: predicated region body
PF: predicated region fallthrough
CT: control target
= control target key end

     0   :  { %8 = vsyncpa [#allocation3], 0  ;;  %s171_s0 = inlined_call_operand.hbm [shape: f32[8,32], index: 0, kind: input, shape index: {}]   ;;  %s172_s1 = inlined_call_operand.vmem [shape: f32[1,32], index: 1, kind: input, shape index: {}]   ;;  %s173_s2 = inlined_call_operand.vmem [shape: f32[1,32], index: 2, kind: input, shape index: {}]   ;;  %s174_s3 = inlined_call_operand.hbm [shape: f32[8,32], index: 3, kind: output, shape index: {}]  }
   0x1   :  { %9 = vsyncpa [#allocation4], 0  ;;  %s134_s12 = smov [#allocation2]  }
   0x2   :  { %s16_s13 = sshll.u32 %s134_s12, 4  ;;  %s17_s13 = int_to_ptr.vmem [resolvable:$true] %s16_s13 }
   0x3   :  { %s98_s14 = scalar_lea.vmem %s17_s13, 128  ;;  %p103_p1 = scmp.lt.s32.totalorder %s17_s13, %s17_s13 }
   0x4   :  { %p99_p0 = scmp.ne.s32.totalorder %s17_s13, %s98_s14  ;;  %p104_p2 = scmp.lt.s32.totalorder %s98_s14, %s98_s14 }
   0x6   :  { %p105_p3 = por %p104_p2, %p103_p1 }
   0x8   :  { %p106_p4 = pnand %p105_p3, %p99_p0 }
   0xa   :  { %109 = shalt.err (!%p106_p4)
}
   0xb   :  { %19 = dma.hbm_to_vmem [thread:$0]  %s171_s0, 128, %s17_s13, [#allocation3]  }
   0xc   :  { %130 = dma.done.wait [#allocation3], 128  }
   0xd   :  { %131 = vsyncadd [#allocation3], 4294967168  ;;  %vm28_vm0 = vcmask 261120   ;;  %v27_v0 = vld [vmem:[#allocation2] sm:$0xff]  ;;  %v57_v22 = vlaneseq  ;;  %s135_s20 = smov [#allocation5]  }
   0xe   :  { %v29_v1 = vsel %vm28_vm0, %v27_v0, 0.0  ;;  %v37_v2 = vmul.f32 %v27_v0, %v27_v0  ;;  %v49_v24 = vld [vmem:[%s172_s1] sm:$0x1]  ;;  %s77_s21 = sshll.u32 %s135_s20, 4  ;;  %s78_s21 = int_to_ptr.vmem [resolvable:$true] %s77_s21 }
   0xf   :  { %v30_v3 = vrot.slane %v29_v1, 4  ;;  %v58_v23 = vshrl.u32 %v57_v22, 7  ;;  %v53_v28 = vld [vmem:[%s173_s2] sm:$0x1]  ;;  %s110_s22 = scalar_lea.vmem %s78_s21, 128  ;;  %p115_p6 = scmp.lt.s32.totalorder %s78_s21, %s78_s21 }
  0x10   :  { %v38_v4 = vsel %vm28_vm0, %v37_v2, 0.0  ;;  %p111_p5 = scmp.ne.s32.totalorder %s78_s21, %s110_s22  ;;  %p116_p7 = scmp.lt.s32.totalorder %s110_s22, %s110_s22 }
  0x11   :  { %v31_v5 = vadd.f32 %v30_v3, %v29_v1  ;;  %v39_v6 = vrot.slane %v38_v4, 4  ;;  %v59_v25 = vsub.s32 0, %v58_v23 }
  0x12   :  { %p117_p8 = por %p116_p7, %p115_p6 }
  0x13   :  { %v32_v7 = vrot.slane %v31_v5, 2  ;;  %v40_v8 = vadd.f32 %v39_v6, %v38_v4 }
  0x14   :  { %p118_p9 = pnand %p117_p8, %p111_p5 }
  0x15   :  { %v33_v9 = vadd.f32 %v32_v7, %v31_v5  ;;  %v41_v10 = vrot.slane %v40_v8, 2 }
  0x17   :  { %v34_v11 = vrot.slane %v33_v9, 1  ;;  %v42_v12 = vadd.f32 %v41_v10, %v40_v8 }
  0x19   :  { %v35_v13 = vadd.f32 %v34_v11, %v33_v9  ;;  %v43_v14 = vrot.slane %v42_v12, 1 }
  0x1b   :  { %v36_v15 = vmul.f32 0.125, %v35_v13  ;;  %v44_v16 = vadd.f32 %v43_v14, %v42_v12 }
  0x1d   :  { %v45_v17 = vmul.f32 0.125, %v44_v16  ;;  %v46_v18 = vmul.f32 %v36_v15, %v36_v15 }
  0x1f   :  { %v47_v19 = vsub.f32 %v45_v17, %v46_v18 }
  0x21   :  { %v48_v20 = vmax.f32 %v47_v19, 0.0 }
  0x23   :  { %v50_v21 = vadd.f32 1e-05, %v48_v20 }
  0x25   :  { %88 = vrsqrt.f32 %v50_v21 }
  0x32   :  { %v89_v26 = vpop.eup %88 }
  0x33   :  { %v52_v27 = vmul.f32 %v89_v26, %v49_v24 }
  0x35   :  { %v54_v29 = vmul.f32 %v52_v27, %v36_v15  ;;  %v60_v30 = vrot.slane %v52_v27, %v59_v25 }
  0x37   :  { %v55_v31 = vsub.f32 %v53_v28, %v54_v29  ;;  %v62_v32 = vmul.f32 %v60_v30, %v27_v0 }
  0x39   :  { %v67_v33 = vrot.slane %v55_v31, %v59_v25 }
  0x3b   :  { %v69_v34 = vadd.f32 %v67_v33, %v62_v32 }
  0x3d   :  { %70 = vst.msk [vmem:[#allocation5] sm:$0xff] %vm28_vm0, %v69_v34 }
  0x3e   :  { %121 = shalt.err (!%p118_p9)
}
  0x3f   :  { %80 = dma.vmem_to_hbm [thread:$0]  %s78_s21, 128, %s174_s3, [#allocation4]  }
  0x40   :  { %132 = dma.done.wait [#allocation4], 128  }
  0x41   :  { %133 = vsyncadd [#allocation4], 4294967168 }
  0x42   :  { %84 = vsyncpa [#allocation3], 1 }
  0x43   :  { %85 = vsyncpa [#allocation4], 1 }

</bundles_post_ra>
